<compile_context>
chip_gen: v7x
topology: tpu7x:2x2x1
jax: 0.10.0
libtpu: 0.0.40
codegen_flags: <defaults>
</compile_context>

<pallas_src>
import jax
import jax.numpy as jnp
from jax.experimental import pallas as pl
from jax.experimental.pallas import tpu as pltpu


# ------------------------------- Pallas kernel --------------------------------

def upsampling_bottleneck_kernel(x_ref, sub_ref,
                                 wm_ref, bm_ref, w1_ref, b1_ref,
                                 wt_ref, bt_ref, w2_ref, b2_ref,
                                 o_ref):
    """Channels-first formulation, one R-tile of pixels per grid step.

    x_ref   : (Cin,  Rt)   bf16 activations, Rt pixels in the lane axis
    sub_ref : (Cout, Rt)   int32 sub-position (0..3) of each pixel's MaxUnpool index
    wm/bm   : (Cout, Cin) bf16 / (Cout, 1) f32     main_conv1 (BN folded)
    w1/b1   : (Ci,   Cin) bf16 / (Ci,   1) f32     ext_conv1  (BN folded)
    wt/bt   : (4*Ci, Ci)  bf16 / (4*Ci, 1) f32     ext_tconv1 stacked over p (BN folded)
    w2/b2   : (Cout, Ci)  bf16 / (Cout, 1) f32     ext_conv2  (BN folded)
    o_ref   : (4*Cout, Rt) bf16   rows = p*Cout + c, cols = pixel index, p = dy*2+dx
    """
    Cout = wm_ref.shape[0]
    Ci = w1_ref.shape[0]

    x = x_ref[...]                                                   # bf16 (Cin, Rt)

    # --- main branch: 1x1 conv + folded eval-mode BN (no activation) ----------
    main = jnp.dot(wm_ref[...], x, preferred_element_type=jnp.float32) + bm_ref[...]

    # --- ext branch ------------------------------------------------------------
    h1 = jnp.maximum(
        jnp.dot(w1_ref[...], x, preferred_element_type=jnp.float32) + b1_ref[...], 0.0)
    h1 = h1.astype(jnp.bfloat16)
    # ConvTranspose2d(k=2, s=2): each input pixel feeds 4 disjoint output positions,
    # computed as one stacked (4*Ci, Ci) matmul.
    h2 = jnp.maximum(
        jnp.dot(wt_ref[...], h1, preferred_element_type=jnp.float32) + bt_ref[...], 0.0)

    sub = sub_ref[...]                                               # (Cout, Rt) int32

    # --- ext_conv2 per sub-position + MaxUnpool mask + residual add + ReLU -----
    for p in range(4):                                               # unrolled, static slices
        h2_p = h2[p * Ci:(p + 1) * Ci, :].astype(jnp.bfloat16)       # (Ci, Rt)
        h3_p = jnp.maximum(
            jnp.dot(w2_ref[...], h2_p, preferred_element_type=jnp.float32) + b2_ref[...],
            0.0)                                                     # (Cout, Rt) f32
        unpooled = jnp.where(sub == p, main, 0.0)                    # mask-based MaxUnpool2d
        o_ref[p * Cout:(p + 1) * Cout, :] = jnp.maximum(
            unpooled + h3_p, 0.0).astype(o_ref.dtype)


# --------------------------------- wrapper ------------------------------------

def _pick_r_tile(R, target=4096):
    """Largest multiple of 128 that divides R and is <= target (fallback: whole R)."""
    if R % 128 != 0:
        return R
    t = max(128, min(R, target) // 128 * 128)
    while R % t != 0:
        t -= 128
    return t


def upsampling_bottleneck(x, max_indices, wm, bm, w1, b1, wt, bt, w2, b2, r_tile=None):
    """x: (N, Hin, Win, Cin) NHWC.  max_indices: (N, Hin, Win, Cout) int32, flat indices
    into the (Hout*Wout) output spatial map (as produced by MaxPool2d(2, return_indices=True)).
    Weights are BN-folded 'math layout' params (see init_params)."""
    N, Hin, Win, Cin = x.shape
    Cout = wm.shape[0]
    Ci = w1.shape[0]
    Hout, Wout = 2 * Hin, 2 * Win
    R = N * Hin * Win

    if r_tile is None:
        r_tile = _pick_r_tile(R)
    assert R % r_tile == 0
    num_tiles = R // r_tile

    # ---- wrapper-side layout plumbing (kept out of the kernel) ----
    x2 = jnp.transpose(x, (3, 0, 1, 2)).reshape(Cin, R).astype(jnp.bfloat16)
    idx2 = jnp.transpose(max_indices, (3, 0, 1, 2)).reshape(Cout, R).astype(jnp.int32)
    # 2-bit sub-position inside each pixel's own 2x2 output window: p = dy*2 + dx.
    # (Valid because MaxPool2d(2, stride=2) indices always lie inside that window.)
    sub = (((idx2 // Wout) % 2) * 2 + (idx2 % 2)).astype(jnp.int32)

    # ---- kernel weight layouts (bf16 weights, f32 biases) ----
    wm_k = wm.astype(jnp.bfloat16)
    w1_k = w1.astype(jnp.bfloat16)
    wt_k = wt.reshape(4, Ci, Ci).reshape(4 * Ci, Ci).astype(jnp.bfloat16)   # rows p*Ci + co
    w2_k = w2.astype(jnp.bfloat16)
    bm_k = bm.reshape(Cout, 1).astype(jnp.float32)
    b1_k = b1.reshape(Ci, 1).astype(jnp.float32)
    bt_k = jnp.tile(bt.reshape(Ci, 1), (4, 1)).astype(jnp.float32)
    b2_k = b2.reshape(Cout, 1).astype(jnp.float32)

    flops = 2 * R * (Cout * Cin + Ci * Cin + 4 * Ci * Ci + 4 * Ci * Cout)
    bytes_accessed = (2 * x2.size + 4 * sub.size                      # bf16 x, int32 subpos
                      + 2 * (wm_k.size + w1_k.size + wt_k.size + w2_k.size)
                      + 4 * (bm_k.size + b1_k.size + bt_k.size + b2_k.size)
                      + 2 * 4 * Cout * R)                             # bf16 output slab

    out2 = pl.pallas_call(
        upsampling_bottleneck_kernel,
        out_shape=jax.ShapeDtypeStruct((4 * Cout, R), jnp.bfloat16),
        grid=(num_tiles,),
        in_specs=[
            pl.BlockSpec((Cin, r_tile), lambda i: (0, i)),            # x2 (lane-tiled)
            pl.BlockSpec((Cout, r_tile), lambda i: (0, i)),           # subpos (lane-tiled)
            pl.BlockSpec((Cout, Cin), lambda i: (0, 0)),              # wm (VMEM-resident)
            pl.BlockSpec((Cout, 1), lambda i: (0, 0)),                # bm
            pl.BlockSpec((Ci, Cin), lambda i: (0, 0)),                # w1
            pl.BlockSpec((Ci, 1), lambda i: (0, 0)),                  # b1
            pl.BlockSpec((4 * Ci, Ci), lambda i: (0, 0)),             # wt (stacked)
            pl.BlockSpec((4 * Ci, 1), lambda i: (0, 0)),              # bt
            pl.BlockSpec((Cout, Ci), lambda i: (0, 0)),               # w2
            pl.BlockSpec((Cout, 1), lambda i: (0, 0)),                # b2
        ],
        out_specs=pl.BlockSpec((4 * Cout, r_tile), lambda i: (0, i)),
        compiler_params=pltpu.CompilerParams(
            dimension_semantics=("parallel",)),                       # shard pixels across TCs
        cost_estimate=pl.CostEstimate(flops=flops, transcendentals=0,
                                      bytes_accessed=bytes_accessed),
    )(x2, sub, wm_k, bm_k, w1_k, b1_k, wt_k, bt_k, w2_k, b2_k)

    # (p, c, r) -> NHWC: rows = (dy, dx, c), cols = (n, h, w).  Done in bf16; in a real
    # pipeline keep the channels-first slab as the inter-layer layout instead.
    out = out2.reshape(2, 2, Cout, N, Hin, Win)
    out = jnp.transpose(out, (3, 4, 0, 5, 1, 2)).reshape(N, Hout, Wout, Cout)
    return out.astype(x.dtype)


# ------------------------- parameter construction -----------------------------

def fold_bn_conv(w, gamma, beta, mean, var, eps=1e-5):
    """Fold eval-mode BN into a bias-less Conv2d weight (O, I, kh, kw)."""
    scale = gamma / jnp.sqrt(var + eps)
    return w * scale[:, None, None, None], beta - mean * scale


def fold_bn_tconv(w, gamma, beta, mean, var, eps=1e-5):
    """Fold eval-mode BN into a bias-less ConvTranspose2d weight (I, O, kh, kw)."""
    scale = gamma / jnp.sqrt(var + eps)
    return w * scale[None, :, None, None], beta - mean * scale


def init_params(key, cin, cout, ci):
    keys = jax.random.split(key, 8)

    def conv_w(k, o, i, kh, kw):
        return 0.1 * jax.random.normal(k, (o, i, kh, kw), jnp.float32)

    def bn_stats(k, c):
        k1, k2, k3, k4 = jax.random.split(k, 4)
        gamma = 1.0 + 0.1 * jax.random.normal(k1, (c,), jnp.float32)
        beta = 0.1 * jax.random.normal(k2, (c,), jnp.float32)
        mean = 0.1 * jax.random.normal(k3, (c,), jnp.float32)
        var = 0.5 + jax.random.uniform(k4, (c,), jnp.float32)
        return gamma, beta, mean, var

    wm_raw = conv_w(keys[0], cout, cin, 1, 1)                       # main_conv1
    w1_raw = conv_w(keys[1], ci, cin, 1, 1)                         # ext_conv1
    wt_raw = 0.1 * jax.random.normal(keys[2], (ci, ci, 2, 2), jnp.float32)  # ext_tconv1 (I,O,kh,kw)
    w2_raw = conv_w(keys[3], cout, ci, 1, 1)                        # ext_conv2

    wm_f, bm = fold_bn_conv(wm_raw, *bn_stats(keys[4], cout))
    w1_f, b1 = fold_bn_conv(w1_raw, *bn_stats(keys[5], ci))
    wt_f, bt = fold_bn_tconv(wt_raw, *bn_stats(keys[6], ci))
    w2_f, b2 = fold_bn_conv(w2_raw, *bn_stats(keys[7], cout))

    wm = wm_f[:, :, 0, 0]                    # (Cout, Cin)
    w1 = w1_f[:, :, 0, 0]                    # (Ci, Cin)
    wt = jnp.transpose(wt_f, (2, 3, 1, 0))   # (dy, dx, O=Ci, I=Ci)
    w2 = w2_f[:, :, 0, 0]                    # (Cout, Ci)
    return wm, bm, w1, b1, wt, bt, w2, b2


# ------------------------------ pure-JAX reference ----------------------------

def reference(x, max_indices, wm, bm, w1, b1, wt, bt, w2, b2):
    N, Hin, Win, Cin = x.shape
    Cout = wm.shape[0]
    Ci = w1.shape[0]
    Hout, Wout = 2 * Hin, 2 * Win

    # main branch: 1x1 conv + BN, then MaxUnpool2d(k=2) via a true scatter
    main = jnp.einsum('nhwc,oc->nhwo', x, wm) + bm                  # (N,Hin,Win,Cout)
    n_i = jnp.arange(N)[:, None, None, None]
    c_i = jnp.arange(Cout)[None, None, None, :]
    unpooled = jnp.zeros((N, Hout * Wout, Cout), x.dtype).at[n_i, max_indices, c_i].set(main)
    unpooled = unpooled.reshape(N, Hout, Wout, Cout)

    # ext branch
    h1 = jax.nn.relu(jnp.einsum('nhwc,oc->nhwo', x, w1) + b1)       # (N,Hin,Win,Ci)
    t = jnp.einsum('nhwi,yxoi->nhywxo', h1, wt)                     # (N,Hin,2,Win,2,Ci)
    t = t.reshape(N, Hout, Wout, Ci)
    h2 = jax.nn.relu(t + bt)
    h3 = jax.nn.relu(jnp.einsum('nhwc,oc->nhwo', h2, w2) + b2)      # (N,Hout,Wout,Cout)

    return jax.nn.relu(unpooled + h3)                               # dropout p=0 = identity


# ------------------------------------ main -------------------------------------

if __name__ == "__main__":
    # PyTorch equivalent: x NCHW (2, 16, 16, 16), max_indices (2, 16, 16, 16) int64,
    # output_size -> (2, 16, 32, 32).  Here: NHWC layout, int32 indices.
    N, Cin, Cout = 2, 16, 16
    internal_ratio = 4
    Ci = Cin // internal_ratio
    Hin = Win = 16
    Hout, Wout = 2 * Hin, 2 * Win

    key = jax.random.PRNGKey(0)
    kx, ky, kz, kp = jax.random.split(key, 4)
    x = jax.random.normal(kx, (N, Hin, Win, Cin), jnp.float32)

    # max_indices as produced by MaxPool2d(2, return_indices=True) on a (Hout, Wout) map:
    # each index lies inside its own 2x2 window of the output spatial map.
    dy = jax.random.randint(ky, (N, Hin, Win, Cout), 0, 2)
    dx = jax.random.randint(kz, (N, Hin, Win, Cout), 0, 2)
    hh = jnp.arange(Hin)[None, :, None, None]
    ww = jnp.arange(Win)[None, None, :, None]
    max_indices = ((2 * hh + dy) * Wout + (2 * ww + dx)).astype(jnp.int32)

    params = init_params(kp, Cin, Cout, Ci)

    # r_tile=128 -> grid=(4,) at this demo size, exercising the pipelined parallel grid.
    out = upsampling_bottleneck(x, max_indices, *params, r_tile=128)
    out = jax.block_until_ready(out)

    ref = reference(x, max_indices, *params)
    assert out.shape == (N, Hout, Wout, Cout)
    err = float(jnp.max(jnp.abs(out - ref)))
    # bf16 matmul operands / bf16 output slab -> looser tolerance than pure f32.
    assert jnp.allclose(out, ref, rtol=5e-2, atol=5e-2), err
    print("KERNEL_OK")
</pallas_src>

<mosaic_0001>
module attributes {stable_mosaic.version = 11 : i64} {
  func.func @upsampling_bottleneck_kernel(%arg0: i32, %arg1: memref<16x128xbf16, #tpu.memory_space<vmem>>, %arg2: memref<16x128xi32, #tpu.memory_space<vmem>>, %arg3: memref<16x16xbf16, #tpu.memory_space<vmem>>, %arg4: memref<16x1xf32, #tpu.memory_space<vmem>>, %arg5: memref<4x16xbf16, #tpu.memory_space<vmem>>, %arg6: memref<4x1xf32, #tpu.memory_space<vmem>>, %arg7: memref<16x4xbf16, #tpu.memory_space<vmem>>, %arg8: memref<16x1xf32, #tpu.memory_space<vmem>>, %arg9: memref<16x4xbf16, #tpu.memory_space<vmem>>, %arg10: memref<16x1xf32, #tpu.memory_space<vmem>>, %arg11: memref<64x128xbf16, #tpu.memory_space<vmem>>) attributes {dimension_semantics = [#tpu.dimension_semantics<parallel>], iteration_bounds = array<i64: 4>, scalar_prefetch = 0 : i64, scratch_operands = 0 : i64, tpu.core_type = #tpu.core_type<tc>, window_params = [{transform_indices = @transform_0, window_bounds = array<i64: 16, 128>}, {transform_indices = @transform_1, window_bounds = array<i64: 16, 128>}, {pipeline_mode = #tpu.pipeline_mode<synchronous>, transform_indices = @transform_2, window_bounds = array<i64: 16, 16>}, {pipeline_mode = #tpu.pipeline_mode<synchronous>, transform_indices = @transform_3, window_bounds = array<i64: 16, 1>}, {pipeline_mode = #tpu.pipeline_mode<synchronous>, transform_indices = @transform_4, window_bounds = array<i64: 4, 16>}, {pipeline_mode = #tpu.pipeline_mode<synchronous>, transform_indices = @transform_5, window_bounds = array<i64: 4, 1>}, {pipeline_mode = #tpu.pipeline_mode<synchronous>, transform_indices = @transform_6, window_bounds = array<i64: 16, 4>}, {pipeline_mode = #tpu.pipeline_mode<synchronous>, transform_indices = @transform_7, window_bounds = array<i64: 16, 1>}, {pipeline_mode = #tpu.pipeline_mode<synchronous>, transform_indices = @transform_8, window_bounds = array<i64: 16, 4>}, {pipeline_mode = #tpu.pipeline_mode<synchronous>, transform_indices = @transform_9, window_bounds = array<i64: 16, 1>}, {transform_indices = @transform_10, window_bounds = array<i64: 64, 128>}]} {
    %c0 = arith.constant 0 : index
    %c0_0 = arith.constant 0 : index
    %0 = vector.load %arg1[%c0, %c0_0] : memref<16x128xbf16, #tpu.memory_space<vmem>>, vector<16x128xbf16>
    %c0_1 = arith.constant 0 : index
    %c0_2 = arith.constant 0 : index
    %1 = vector.load %arg3[%c0_1, %c0_2] : memref<16x16xbf16, #tpu.memory_space<vmem>>, vector<16x16xbf16>
    %cst = arith.constant dense<0.000000e+00> : vector<16x128xf32>
    %2 = tpu.matmul %1, %0, %cst {dimension_numbers = #tpu.dot_dimension_numbers<[1], [0], [0], [1], [0, 0, 1, 1], [], []>} : vector<16x16xbf16>, vector<16x128xbf16>, vector<16x128xf32> -> vector<16x128xf32>
    %c0_3 = arith.constant 0 : index
    %c0_4 = arith.constant 0 : index
    %3 = vector.load %arg4[%c0_3, %c0_4] : memref<16x1xf32, #tpu.memory_space<vmem>>, vector<16x1xf32>
    %4 = vector.broadcast %3 : vector<16x1xf32> to vector<16x128xf32>
    %5 = arith.addf %2, %4 : vector<16x128xf32>
    %c0_5 = arith.constant 0 : index
    %c0_6 = arith.constant 0 : index
    %6 = vector.load %arg5[%c0_5, %c0_6] : memref<4x16xbf16, #tpu.memory_space<vmem>>, vector<4x16xbf16>
    %cst_7 = arith.constant dense<0.000000e+00> : vector<4x128xf32>
    %7 = tpu.matmul %6, %0, %cst_7 {dimension_numbers = #tpu.dot_dimension_numbers<[1], [0], [0], [1], [0, 0, 1, 1], [], []>} : vector<4x16xbf16>, vector<16x128xbf16>, vector<4x128xf32> -> vector<4x128xf32>
    %c0_8 = arith.constant 0 : index
    %c0_9 = arith.constant 0 : index
    %8 = vector.load %arg6[%c0_8, %c0_9] : memref<4x1xf32, #tpu.memory_space<vmem>>, vector<4x1xf32>
    %9 = vector.broadcast %8 : vector<4x1xf32> to vector<4x128xf32>
    %10 = arith.addf %7, %9 : vector<4x128xf32>
    %cst_10 = arith.constant 0.000000e+00 : f32
    %11 = vector.broadcast %cst_10 : f32 to vector<4x128xf32>
    %12 = arith.maximumf %10, %11 : vector<4x128xf32>
    %13 = arith.truncf %12 : vector<4x128xf32> to vector<4x128xbf16>
    %c0_11 = arith.constant 0 : index
    %c0_12 = arith.constant 0 : index
    %14 = vector.load %arg7[%c0_11, %c0_12] : memref<16x4xbf16, #tpu.memory_space<vmem>>, vector<16x4xbf16>
    %cst_13 = arith.constant dense<0.000000e+00> : vector<16x128xf32>
    %15 = tpu.matmul %14, %13, %cst_13 {dimension_numbers = #tpu.dot_dimension_numbers<[1], [0], [0], [1], [0, 0, 1, 1], [], []>} : vector<16x4xbf16>, vector<4x128xbf16>, vector<16x128xf32> -> vector<16x128xf32>
    %c0_14 = arith.constant 0 : index
    %c0_15 = arith.constant 0 : index
    %16 = vector.load %arg8[%c0_14, %c0_15] : memref<16x1xf32, #tpu.memory_space<vmem>>, vector<16x1xf32>
    %17 = vector.broadcast %16 : vector<16x1xf32> to vector<16x128xf32>
    %18 = arith.addf %15, %17 : vector<16x128xf32>
    %cst_16 = arith.constant 0.000000e+00 : f32
    %19 = vector.broadcast %cst_16 : f32 to vector<16x128xf32>
    %20 = arith.maximumf %18, %19 : vector<16x128xf32>
    %c0_17 = arith.constant 0 : index
    %c0_18 = arith.constant 0 : index
    %21 = vector.load %arg2[%c0_17, %c0_18] : memref<16x128xi32, #tpu.memory_space<vmem>>, vector<16x128xi32>
    %22 = vector.extract_strided_slice %20 {offsets = [0, 0], sizes = [4, 128], strides = [1, 1]} : vector<16x128xf32> to vector<4x128xf32>
    %23 = arith.truncf %22 : vector<4x128xf32> to vector<4x128xbf16>
    %c0_19 = arith.constant 0 : index
    %c0_20 = arith.constant 0 : index
    %24 = vector.load %arg9[%c0_19, %c0_20] : memref<16x4xbf16, #tpu.memory_space<vmem>>, vector<16x4xbf16>
    %cst_21 = arith.constant dense<0.000000e+00> : vector<16x128xf32>
    %25 = tpu.matmul %24, %23, %cst_21 {dimension_numbers = #tpu.dot_dimension_numbers<[1], [0], [0], [1], [0, 0, 1, 1], [], []>} : vector<16x4xbf16>, vector<4x128xbf16>, vector<16x128xf32> -> vector<16x128xf32>
    %c0_22 = arith.constant 0 : index
    %c0_23 = arith.constant 0 : index
    %26 = vector.load %arg10[%c0_22, %c0_23] : memref<16x1xf32, #tpu.memory_space<vmem>>, vector<16x1xf32>
    %27 = vector.broadcast %26 : vector<16x1xf32> to vector<16x128xf32>
    %28 = arith.addf %25, %27 : vector<16x128xf32>
    %cst_24 = arith.constant 0.000000e+00 : f32
    %29 = vector.broadcast %cst_24 : f32 to vector<16x128xf32>
    %30 = arith.maximumf %28, %29 : vector<16x128xf32>
    %c0_i32 = arith.constant 0 : i32
    %31 = vector.broadcast %c0_i32 : i32 to vector<16x128xi32>
    %32 = arith.cmpi eq, %21, %31 : vector<16x128xi32>
    %cst_25 = arith.constant 0.000000e+00 : f32
    %33 = vector.broadcast %cst_25 : f32 to vector<16x128xf32>
    %34 = arith.select %32, %5, %33 : vector<16x128xi1>, vector<16x128xf32>
    %35 = arith.addf %34, %30 : vector<16x128xf32>
    %cst_26 = arith.constant 0.000000e+00 : f32
    %36 = vector.broadcast %cst_26 : f32 to vector<16x128xf32>
    %37 = arith.maximumf %35, %36 : vector<16x128xf32>
    %38 = arith.truncf %37 : vector<16x128xf32> to vector<16x128xbf16>
    %c0_27 = arith.constant 0 : index
    %c0_28 = arith.constant 0 : index
    %39 = vector.load %arg11[%c0_27, %c0_28] : memref<64x128xbf16, #tpu.memory_space<vmem>>, vector<16x128xbf16>
    tpu.vector_store %arg11[%c0_27, %c0_28], %38 {strides = array<i32>} : memref<64x128xbf16, #tpu.memory_space<vmem>>, vector<16x128xbf16>,
    %40 = vector.extract_strided_slice %20 {offsets = [4, 0], sizes = [4, 128], strides = [1, 1]} : vector<16x128xf32> to vector<4x128xf32>
    %41 = arith.truncf %40 : vector<4x128xf32> to vector<4x128xbf16>
    %c0_29 = arith.constant 0 : index
    %c0_30 = arith.constant 0 : index
    %42 = vector.load %arg9[%c0_29, %c0_30] : memref<16x4xbf16, #tpu.memory_space<vmem>>, vector<16x4xbf16>
    %cst_31 = arith.constant dense<0.000000e+00> : vector<16x128xf32>
    %43 = tpu.matmul %42, %41, %cst_31 {dimension_numbers = #tpu.dot_dimension_numbers<[1], [0], [0], [1], [0, 0, 1, 1], [], []>} : vector<16x4xbf16>, vector<4x128xbf16>, vector<16x128xf32> -> vector<16x128xf32>
    %c0_32 = arith.constant 0 : index
    %c0_33 = arith.constant 0 : index
    %44 = vector.load %arg10[%c0_32, %c0_33] : memref<16x1xf32, #tpu.memory_space<vmem>>, vector<16x1xf32>
    %45 = vector.broadcast %44 : vector<16x1xf32> to vector<16x128xf32>
    %46 = arith.addf %43, %45 : vector<16x128xf32>
    %cst_34 = arith.constant 0.000000e+00 : f32
    %47 = vector.broadcast %cst_34 : f32 to vector<16x128xf32>
    %48 = arith.maximumf %46, %47 : vector<16x128xf32>
    %c1_i32 = arith.constant 1 : i32
    %49 = vector.broadcast %c1_i32 : i32 to vector<16x128xi32>
    %50 = arith.cmpi eq, %21, %49 : vector<16x128xi32>
    %cst_35 = arith.constant 0.000000e+00 : f32
    %51 = vector.broadcast %cst_35 : f32 to vector<16x128xf32>
    %52 = arith.select %50, %5, %51 : vector<16x128xi1>, vector<16x128xf32>
    %53 = arith.addf %52, %48 : vector<16x128xf32>
    %cst_36 = arith.constant 0.000000e+00 : f32
    %54 = vector.broadcast %cst_36 : f32 to vector<16x128xf32>
    %55 = arith.maximumf %53, %54 : vector<16x128xf32>
    %56 = arith.truncf %55 : vector<16x128xf32> to vector<16x128xbf16>
    %c16 = arith.constant 16 : index
    %c0_37 = arith.constant 0 : index
    %57 = vector.load %arg11[%c16, %c0_37] : memref<64x128xbf16, #tpu.memory_space<vmem>>, vector<16x128xbf16>
    tpu.vector_store %arg11[%c16, %c0_37], %56 {strides = array<i32>} : memref<64x128xbf16, #tpu.memory_space<vmem>>, vector<16x128xbf16>,
    %58 = vector.extract_strided_slice %20 {offsets = [8, 0], sizes = [4, 128], strides = [1, 1]} : vector<16x128xf32> to vector<4x128xf32>
    %59 = arith.truncf %58 : vector<4x128xf32> to vector<4x128xbf16>
    %c0_38 = arith.constant 0 : index
    %c0_39 = arith.constant 0 : index
    %60 = vector.load %arg9[%c0_38, %c0_39] : memref<16x4xbf16, #tpu.memory_space<vmem>>, vector<16x4xbf16>
    %cst_40 = arith.constant dense<0.000000e+00> : vector<16x128xf32>
    %61 = tpu.matmul %60, %59, %cst_40 {dimension_numbers = #tpu.dot_dimension_numbers<[1], [0], [0], [1], [0, 0, 1, 1], [], []>} : vector<16x4xbf16>, vector<4x128xbf16>, vector<16x128xf32> -> vector<16x128xf32>
    %c0_41 = arith.constant 0 : index
    %c0_42 = arith.constant 0 : index
    %62 = vector.load %arg10[%c0_41, %c0_42] : memref<16x1xf32, #tpu.memory_space<vmem>>, vector<16x1xf32>
    %63 = vector.broadcast %62 : vector<16x1xf32> to vector<16x128xf32>
    %64 = arith.addf %61, %63 : vector<16x128xf32>
    %cst_43 = arith.constant 0.000000e+00 : f32
    %65 = vector.broadcast %cst_43 : f32 to vector<16x128xf32>
    %66 = arith.maximumf %64, %65 : vector<16x128xf32>
    %c2_i32 = arith.constant 2 : i32
    %67 = vector.broadcast %c2_i32 : i32 to vector<16x128xi32>
    %68 = arith.cmpi eq, %21, %67 : vector<16x128xi32>
    %cst_44 = arith.constant 0.000000e+00 : f32
    %69 = vector.broadcast %cst_44 : f32 to vector<16x128xf32>
    %70 = arith.select %68, %5, %69 : vector<16x128xi1>, vector<16x128xf32>
    %71 = arith.addf %70, %66 : vector<16x128xf32>
    %cst_45 = arith.constant 0.000000e+00 : f32
    %72 = vector.broadcast %cst_45 : f32 to vector<16x128xf32>
    %73 = arith.maximumf %71, %72 : vector<16x128xf32>
    %74 = arith.truncf %73 : vector<16x128xf32> to vector<16x128xbf16>
    %c32 = arith.constant 32 : index
    %c0_46 = arith.constant 0 : index
    %75 = vector.load %arg11[%c32, %c0_46] : memref<64x128xbf16, #tpu.memory_space<vmem>>, vector<16x128xbf16>
    tpu.vector_store %arg11[%c32, %c0_46], %74 {strides = array<i32>} : memref<64x128xbf16, #tpu.memory_space<vmem>>, vector<16x128xbf16>,
    %76 = vector.extract_strided_slice %20 {offsets = [12, 0], sizes = [4, 128], strides = [1, 1]} : vector<16x128xf32> to vector<4x128xf32>
    %77 = arith.truncf %76 : vector<4x128xf32> to vector<4x128xbf16>
    %c0_47 = arith.constant 0 : index
    %c0_48 = arith.constant 0 : index
    %78 = vector.load %arg9[%c0_47, %c0_48] : memref<16x4xbf16, #tpu.memory_space<vmem>>, vector<16x4xbf16>
    %cst_49 = arith.constant dense<0.000000e+00> : vector<16x128xf32>
    %79 = tpu.matmul %78, %77, %cst_49 {dimension_numbers = #tpu.dot_dimension_numbers<[1], [0], [0], [1], [0, 0, 1, 1], [], []>} : vector<16x4xbf16>, vector<4x128xbf16>, vector<16x128xf32> -> vector<16x128xf32>
    %c0_50 = arith.constant 0 : index
    %c0_51 = arith.constant 0 : index
    %80 = vector.load %arg10[%c0_50, %c0_51] : memref<16x1xf32, #tpu.memory_space<vmem>>, vector<16x1xf32>
    %81 = vector.broadcast %80 : vector<16x1xf32> to vector<16x128xf32>
    %82 = arith.addf %79, %81 : vector<16x128xf32>
    %cst_52 = arith.constant 0.000000e+00 : f32
    %83 = vector.broadcast %cst_52 : f32 to vector<16x128xf32>
    %84 = arith.maximumf %82, %83 : vector<16x128xf32>
    %c3_i32 = arith.constant 3 : i32
    %85 = vector.broadcast %c3_i32 : i32 to vector<16x128xi32>
    %86 = arith.cmpi eq, %21, %85 : vector<16x128xi32>
    %cst_53 = arith.constant 0.000000e+00 : f32
    %87 = vector.broadcast %cst_53 : f32 to vector<16x128xf32>
    %88 = arith.select %86, %5, %87 : vector<16x128xi1>, vector<16x128xf32>
    %89 = arith.addf %88, %84 : vector<16x128xf32>
    %cst_54 = arith.constant 0.000000e+00 : f32
    %90 = vector.broadcast %cst_54 : f32 to vector<16x128xf32>
    %91 = arith.maximumf %89, %90 : vector<16x128xf32>
    %92 = arith.truncf %91 : vector<16x128xf32> to vector<16x128xbf16>
    %c48 = arith.constant 48 : index
    %c0_55 = arith.constant 0 : index
    %93 = vector.load %arg11[%c48, %c0_55] : memref<64x128xbf16, #tpu.memory_space<vmem>>, vector<16x128xbf16>
    tpu.vector_store %arg11[%c48, %c0_55], %92 {strides = array<i32>} : memref<64x128xbf16, #tpu.memory_space<vmem>>, vector<16x128xbf16>,
    return
  }
  func.func @transform_0(%arg0: i32) -> (i32, i32) {
    %c0_i32 = arith.constant 0 : i32
    %c0_i32_0 = arith.constant 0 : i32
    return %c0_i32, %arg0 : i32, i32
  }
  func.func @transform_1(%arg0: i32) -> (i32, i32) {
    %c0_i32 = arith.constant 0 : i32
    %c0_i32_0 = arith.constant 0 : i32
    return %c0_i32, %arg0 : i32, i32
  }
  func.func @transform_2(%arg0: i32) -> (i32, i32) {
    %c0_i32 = arith.constant 0 : i32
    %c0_i32_0 = arith.constant 0 : i32
    %c0_i32_1 = arith.constant 0 : i32
    return %c0_i32, %c0_i32_0 : i32, i32
  }
  func.func @transform_3(%arg0: i32) -> (i32, i32) {
    %c0_i32 = arith.constant 0 : i32
    %c0_i32_0 = arith.constant 0 : i32
    %c0_i32_1 = arith.constant 0 : i32
    return %c0_i32, %c0_i32_0 : i32, i32
  }
  func.func @transform_4(%arg0: i32) -> (i32, i32) {
    %c0_i32 = arith.constant 0 : i32
    %c0_i32_0 = arith.constant 0 : i32
    %c0_i32_1 = arith.constant 0 : i32
    return %c0_i32, %c0_i32_0 : i32, i32
  }
  func.func @transform_5(%arg0: i32) -> (i32, i32) {
    %c0_i32 = arith.constant 0 : i32
    %c0_i32_0 = arith.constant 0 : i32
    %c0_i32_1 = arith.constant 0 : i32
    return %c0_i32, %c0_i32_0 : i32, i32
  }
  func.func @transform_6(%arg0: i32) -> (i32, i32) {
    %c0_i32 = arith.constant 0 : i32
    %c0_i32_0 = arith.constant 0 : i32
    %c0_i32_1 = arith.constant 0 : i32
    return %c0_i32, %c0_i32_0 : i32, i32
  }
  func.func @transform_7(%arg0: i32) -> (i32, i32) {
    %c0_i32 = arith.constant 0 : i32
    %c0_i32_0 = arith.constant 0 : i32
    %c0_i32_1 = arith.constant 0 : i32
    return %c0_i32, %c0_i32_0 : i32, i32
  }
  func.func @transform_8(%arg0: i32) -> (i32, i32) {
    %c0_i32 = arith.constant 0 : i32
    %c0_i32_0 = arith.constant 0 : i32
    %c0_i32_1 = arith.constant 0 : i32
    return %c0_i32, %c0_i32_0 : i32, i32
  }
  func.func @transform_9(%arg0: i32) -> (i32, i32) {
    %c0_i32 = arith.constant 0 : i32
    %c0_i32_0 = arith.constant 0 : i32
    %c0_i32_1 = arith.constant 0 : i32
    return %c0_i32, %c0_i32_0 : i32, i32
  }
  func.func @transform_10(%arg0: i32) -> (i32, i32) {
    %c0_i32 = arith.constant 0 : i32
    %c0_i32_0 = arith.constant 0 : i32
    return %c0_i32, %arg0 : i32, i32
  }
}

</mosaic_0001>

<bundles_post_ra>
// kernel: tpu_custom_call.1
= control target key start
LH: loop header
LB: loop body
LE: loop exit
PB: predicated region body
PF: predicated region fallthrough
CT: control target
= control target key end

     0   :  { %s1701_s0 = inlined_call_operand.hbm [shape: bf16[16,512], index: 0, kind: input, shape index: {}]   ;;  %s1702_s1 = inlined_call_operand.vmem [shape: s32[16,512], index: 1, kind: input, shape index: {}]   ;;  %s1703_s2 = inlined_call_operand.vmem [shape: bf16[16,16], index: 2, kind: input, shape index: {}]   ;;  %s1704_s3 = inlined_call_operand.vmem [shape: f32[16,1], index: 3, kind: input, shape index: {}]   ;;  %s1705_s4 = inlined_call_operand.vmem [shape: bf16[4,16], index: 4, kind: input, shape index: {}]   ;;  %s1706_s5 = inlined_call_operand.vmem [shape: f32[4,1], index: 5, kind: input, shape index: {}]   ;;  %s1707_s6 = inlined_call_operand.vmem [shape: bf16[16,4], index: 6, kind: input, shape index: {}]   ;;  %s1708_s7 = inlined_call_operand.vmem [shape: f32[16,1], index: 7, kind: input, shape index: {}]   ;;  %s1709_s8 = inlined_call_operand.vmem [shape: bf16[16,4], index: 8, kind: input, shape index: {}]   ;;  %s1710_s9 = inlined_call_operand.vmem [shape: f32[16,1], index: 9, kind: input, shape index: {}]   ;;  %s1711_s10 = inlined_call_operand.hbm [shape: bf16[64,512], index: 10, kind: output, shape index: {}]  }
   0x1   :  { %1716 = sst [smem:[#allocation12_spill]] %s1701_s0 }
   0x2   :  { %15 = vsyncpa [#allocation3], 0 }
   0x3   :  { %17 = vsyncpa [#allocation3 + $0x1], 0 }
   0x4   :  { %18 = vsyncpa [#allocation4], 0 }
   0x5   :  { %20 = vsyncpa [#allocation4 + $0x1], 0  ;;  %s1431_s13 = smov 0   ;;  %s1433_s14 = smov 0  }
   0x6   :  { %s1435_s15 = smov 0   ;;  %s1437_s16 = smov 0  }
   0x7 LB: > { %1717 = sst [smem:[#allocation9_spill]] %s1359_s15  ;;  %s1452_s17 = sadd.s32 4294967295, %s1363_s16   ;;  %s1363_s16 = sphi %s1437_s16, %s1727_s16   ;;  %s1359_s15 = sphi %s1435_s15, %s1729_s15   ;;  %s1355_s14 = sphi %s1433_s14, %s1731_s14   ;;  %s1351_s13 = sphi %s1431_s13, %s1730_s13  }
   0x8   : > { %s1086_s18 = sadd.s32 4294967294, %s1363_s16   ;;  %s1456_s19 = sadd.s32 1, %s1363_s16  }
   0x9   : > { %1718 = sst [smem:[#allocation10_spill]] %s1456_s19  ;;  %s33_s20 = sadd.s32 1, %s1359_s15 }
   0xa   : > { %s30_s21 = ssub.s32 %s1363_s16, %s1456_s19  ;;  %p40_p0 = scmp.ne.s32.totalorder %s1359_s15, %s1355_s14 }
   0xb   : > { %p31_p1 = scmp.eq.s32.totalorder %s30_s21, 0  ;;  %p41_p2 = scmp.eq.s32.totalorder %s1363_s16, 0 }
   0xc   : > { %p46_p3 = scmp.ne.s32.totalorder %s1355_s14, %s1351_s13  ;;  %p47_p4 = scmp.eq.s32.totalorder %s1452_s17, 0 }
   0xd   : > { %s1468_s22 = scalar_select %p31_p1, %s1359_s15, %s33_s20  }
   0xe   : > { %p1470_p5 = por %p41_p2, %p40_p0  ;;  %p1474_p6 = por %p47_p4, %p46_p3 }
   0xf   : > { %1719 = sst [smem:[#allocation11_spill]] %s1468_s22  ;;  %p264_p7 = scmp.eq.s32.totalorder %s1452_s17, 3 }
  0x10   : > { %p270_p8 = scmp.eq.s32.totalorder %s1086_s18, 3  ;;  %p1088_p11 = scmp.ge.s32.totalorder %s1363_s16, 4 }
  0x11   : > { %p1479_p9 = por %p264_p7, %p40_p0  ;;  %s1489_s27 = sand.u32 (!%p1088_p11), 1, %s1359_s15  }
  0x12   : > { %p1483_p10 = por %p270_p8, %p46_p3  ;;  %310 = sbr.rel (%p1088_p11) target bundleno = 57 (0x39), region = 48 }
  0x13   : > { %s1722_s25 = scalar_select %p1479_p9, 1, 0 }
  0x14   : > { %s1723_s26 = scalar_select %p1483_p10, 1, 0 }
  0x15   : > { %s1090_s28 = sshll.u32 (!%p1088_p11), %s1363_s16, 6  ;;  %s1089_s29 = sshll.u32 (!%p1088_p11), %s1489_s27, 3 }
  0x16   : > { %s1724_s0 = sld [smem:[#allocation12_spill]] (!%p1088_p11)  ;;  %s318_s18 = scalar_lea.vmem (!%p1088_p11), [#allocation2], %s1089_s29 }
  0x17   : > { %s324_s20 = sshll.u32 (!%p1088_p11), %s318_s18, 4  ;;  %s315_s21 = scalar_lea.sflag (!%p1088_p11), [#allocation3], %s1489_s27  ;;  %s1498_s20 = int_to_ptr.vmem [resolvable:$true] %s324_s20 }
  0x1c   : > { %s1496_s12 = scalar_lea.hbm %s1724_s0, %s1090_s28  ;;  %s1273_s30 = scalar_lea.hbm %s1724_s0, 512 }
  0x1d   : > { %s1269_s22 = scalar_lea.hbm %s1496_s12, 128  ;;  %p1274_p1 = scmp.lt.u32.totalorder %s1496_s12, %s1724_s0 }
  0x1e   : > { %p1270_p12 = scmp.ne.s32.totalorder %s1496_s12, %s1269_s22  ;;  %p1275_p2 = scmp.lt.u32.totalorder %s1273_s30, %s1269_s22 }
  0x1f   : > { %p1277_p4 = scmp.lt.u32.totalorder %s1269_s22, %s1496_s12 }
  0x20   : > { %p1271_p13 = pnand %p1270_p12, %p1470_p5  ;;  %p1276_p3 = por %p1275_p2, %p1274_p1 }
  0x22   : > { %p1272_p0 = pneg %p1271_p13  ;;  %p1278_p7 = por %p1277_p4, %p1276_p3 }
  0x24   : > { %p1279_p8 = pnand %p1278_p7, %p1272_p0 }
  0x26   : > { %1282 = shalt.err (!%p1279_p8)
}
  0x27   : > { %s1283_s29 = scalar_lea.vmem %s1498_s20, 128  ;;  %s1365_s15 = smov [#allocation2]  }
  0x28   : > { %p1284_p11 = scmp.ne.s32.totalorder %s1498_s20, %s1283_s29  ;;  %s1287_s19 = sshll.u32 %s1365_s15, 4  ;;  %s1288_s19 = int_to_ptr.vmem [resolvable:$false] %s1287_s19 }
  0x29   : > { %s1289_s18 = scalar_lea.vmem %s1288_s19, 256  ;;  %p1290_p10 = scmp.lt.s32.totalorder %s1498_s20, %s1288_s19 }
  0x2a   : > { %p1285_p12 = pnand %p1284_p11, %p1470_p5  ;;  %p1291_p9 = scmp.lt.s32.totalorder %s1289_s18, %s1283_s29 }
  0x2c   : > { %p1286_p13 = pneg %p1285_p12  ;;  %p1292_p1 = por %p1291_p9, %p1290_p10 }
  0x2e   : > { %p1293_p2 = pnand %p1292_p1, %p1286_p13 }
  0x30   : > { %1296 = shalt.err (!%p1293_p2)
}
  0x31   : > { %s1366_s22 = smov 256   ;;  %s1367_s30 = smov 64  }
  0x32   : > { %s1368_s28 = smov 4   ;;  %333 = sbr.rel (!%p1470_p5) target bundleno = 57 (0x39), region = 56 }
  0x33   : > { %1210 = dma.hbm_to_vmem [thread:$0]  (%p1470_p5), %s1496_s12, 128, %s1498_s20, %s315_s21, %s1366_s22, %s1367_s30, %s1368_s28  }
  0x34   : > { %s1091_s11 = sshll.u32 (%p1470_p5), %s1489_s27, 4  ;;  %s1092_s29 = sshll.u32 (%p1470_p5), %s1363_s16, 3 }
  0x35   : > { %s339_s18 = scalar_lea.vmem (%p1470_p5), %s1702_s1, %s1092_s29  ;;  %s337_s0 = scalar_lea.vmem (%p1470_p5), [#allocation5], %s1091_s11 }
  0x36   : > { %v369_v0 = vld [vmem:[%s339_s18] sm:$0xff] (%p1470_p5) }
  0x37   : > { %v371_v1 = vld [vmem:[%s339_s18 + $0x20] sm:$0xff] (%p1470_p5)  ;;  %370 = vst [vmem:[%s337_s0] sm:$0xff] (%p1470_p5), %v369_v0 }
  0x38   : > { %372 = vst [vmem:[%s337_s0 + $0x8] sm:$0xff] (%p1470_p5), %v371_v1 }
  0x39 PF: > { %p1093_p9 = scmp.ge.s32.totalorder %s1363_s16, 1  ;;  %p377_p10 = scmp.lt.s32.totalorder %s1363_s16, 5 }
  0x3b   : > { %p378_p5 = pnand %p1093_p9, %p377_p10 }
  0x3c   : > { %s1534_s23 = sand.u32 (!%p378_p5), 1, %s1355_s14  }
  0x3d   : > { %381 = sbr.rel (%p378_p5) target bundleno = 770 (0x302), region = 94  ;;  %s1094_s27 = sshll.u32 (!%p378_p5), %s1534_s23, 3 }
  0x3e   : > { %s384_s12 = scalar_lea.sflag (!%p378_p5), [#allocation3], %s1534_s23  ;;  %s387_s20 = scalar_lea.vmem (!%p378_p5), [#allocation2], %s1094_s27 }
  0x44   : > { %1342 = dma.done.wait (%p1474_p6), %s384_s12, 128  }
  0x45   : > { %1344 = vsyncadd (%p1474_p6), %s384_s12, 4294967168  ;;  %v1369_v2 = vmov 0.0   ;;  %vm1370_vm0 = vmmov 0   ;;  %v1371_v3 = vmov 0   ;;  %v1262_v4 = vld [vmem:[%s387_s20] sm:$0xff]   ;;  %vm463_vm1 = vcmask 130048  }
  0x46   : > { %1168 = vmatprep.subr.bf16.mxu0 %v1369_v2  ;;  %1174 = vmatprep.subr.bf16.mxu1 %v1369_v2  ;;  %v1263_v5 = vld [vmem:[%s1703_s2] sm:$0xff]   ;;  %v636_v9 = vld [vmem:[%s1710_s9 + $0x8] sm:$0xff]  ;;  %vm583_vm2 = vcmask 1041408   ;;  %vm579_vm3 = vcmask 31744   ;;  %s1095_s0 = sshll.u32 %s1534_s23, 4  ;;  %s1096_s24 = sshll.u32 %s1534_s23, 5 }
  0x47   : > { %1170 = vmatprep.mubr.msk.bf16.mxu0 %vm1370_vm0, %v1369_v2  ;;  %1176 = vmatprep.mubr.msk.bf16.mxu1 %vm1370_vm0, %v1369_v2  ;;  %v508_v6 = vld [vmem:[%s1705_s4] sm:$0x3]  ;;  %v441_v10 = vld [vmem:[%s1704_s3 + $0x8] sm:$0xff]  ;;  %s395_s21 = scalar_lea.vmem [#allocation5], %s1095_s0  ;;  %s434_s22 = scalar_lea.vmem [#allocation6], %s1096_s24 }
  0x48   : > { %1260 = vset.pattern.permute.xlu0 %v1371_v3  ;;  %1261 = vset.pattern.permute.xlu1 %v1371_v3  ;;  %v509_v7 = vld [vmem:[%s1706_s5] sm:$0xf]  ;;  %v563_v11 = vld [vmem:[%s1708_s7 + $0x8] sm:$0xff]  ;;  %s995_s30 = sshll.u32 %s434_s22, 4  ;;  %s1120_s28 = sshll.u32 %s1452_s17, 6  ;;  %s1653_s30 = int_to_ptr.vmem [resolvable:$true] %s995_s30 }
  0x49   : > { %1169 = vmatpush3.bf16.msra.mxu0 %v1262_v4  ;;  %1175 = vmatpush3.bf16.msra.mxu1 %v1262_v4  ;;  %v562_v8 = vld [vmem:[%s1708_s7] sm:$0xff]  ;;  %v1624_v60 = vld [vmem:[%s395_s21 + $0x8] sm:$0xff]  ;;  %s1658_s15 = scalar_lea.hbm %s1711_s10, %s1120_s28  ;;  %s983_s19 = scalar_lea.sflag [#allocation4], %s1534_s23 }
  0x4a   : > { %512 = vperm.xlu0 %1260, %v509_v7   ;;  %1180 = vmatprep.subr.bf16.mxu0 %v1369_v2  ;;  %v635_v12 = vld [vmem:[%s1710_s9] sm:$0xff]  ;;  %vm702_vm5 = vcmp.eq.s32.totalorder %v1624_v60, 0  ;;  %vm790_vm7 = vcmp.eq.s32.totalorder %v1624_v60, 1  ;;  %vm877_vm9 = vcmp.eq.s32.totalorder %v1624_v60, 2  ;;  %vm965_vm11 = vcmp.eq.s32.totalorder %v1624_v60, 3  ;;  %s1297_s18 = scalar_lea.vmem %s1653_s30, 512 }
  0x4b   : > { %1186 = vmatprep.subr.bf16.mxu1 %v1369_v2  ;;  %571 = vperm.xlu1 %1261, %v563_v11   ;;  %v440_v13 = vld [vmem:[%s1704_s3] sm:$0xff]  ;;  %p1298_p6 = scmp.ne.s32.totalorder %s1653_s30, %s1297_s18  ;;  %p1725_p0 = scmp.ne.s32.totalorder %s1722_s25, 0 }
  0x4c   : > { %1171 = vmatmul.mubr.msk.bf16.vlgmr.msra.gmra.mrb[0].mxu0 %vm463_vm1, %v1263_v5  ;;  %1177 = vmatmul.mubr.msk.bf16.vlgmr.msra.gmra.mrb[0].mxu1 %vm463_vm1, %v508_v6  ;;  %v1264_v27 = vld [vmem:[%s1707_s6] sm:$0xff]   ;;  %s1372_s17 = smov [#allocation6]  }
  0x4d   : > { %1182 = vmatprep.mubr.msk.bf16.mxu0 %vm1370_vm0, %v1369_v2  ;;  %1188 = vmatprep.mubr.msk.bf16.mxu1 %vm1370_vm0, %v1369_v2  ;;  %v1265_v42 = vld [vmem:[%s1709_s8] sm:$0xff]   ;;  %p1299_p3 = pnand %p1298_p6, %p1725_p0  ;;  %s1301_s27 = sshll.u32 %s1372_s17, 4  ;;  %s1302_s27 = int_to_ptr.vmem [resolvable:$false] %s1301_s27 }
  0x4e   : > { %566 = vperm.xlu0 %1260, %v562_v8   ;;  %v1266_v45 = vld [vmem:[%s1709_s8] sm:$0xff]   ;;  %s1303_s12 = scalar_lea.vmem %s1302_s27, 1024  ;;  %p1304_p7 = scmp.lt.s32.totalorder %s1653_s30, %s1302_s27 }
  0x4f   : > { %639 = vperm.xlu1 %1261, %v635_v12   ;;  %v1267_v48 = vld [vmem:[%s1709_s8] sm:$0xff]   ;;  %p1300_p4 = pneg %p1299_p3  ;;  %p1305_p8 = scmp.lt.s32.totalorder %s1303_s12, %s1297_s18 }
  0x50   : > { %v1268_v49 = vld [vmem:[%s1709_s8] sm:$0xff]  }
  0x51   : > { %v1622_v59 = vld [vmem:[%s395_s21] sm:$0xff]  ;;  %p1306_p11 = por %p1305_p8, %p1304_p7 }
  0x52   : > { %644 = vperm.xlu0 %1260, %v636_v9   ;;  %vm701_vm4 = vcmp.eq.s32.totalorder %v1622_v59, 0  ;;  %vm789_vm6 = vcmp.eq.s32.totalorder %v1622_v59, 1  ;;  %vm876_vm8 = vcmp.eq.s32.totalorder %v1622_v59, 2  ;;  %vm964_vm10 = vcmp.eq.s32.totalorder %v1622_v59, 3 }
  0x53   : > { %725 = vperm.xlu1 %1261, %v635_v12   ;;  %p1307_p12 = pnand %p1306_p11, %p1300_p4 }
  0x56   : > { %730 = vperm.xlu0 %1260, %v636_v9  }
  0x57   : > { %814 = vperm.xlu1 %1261, %v635_v12  }
  0x5a   : > { %819 = vperm.xlu0 %1260, %v636_v9  }
  0x5b   : > { %900 = vperm.xlu1 %1261, %v635_v12  }
  0x5e   : > { %905 = vperm.xlu0 %1260, %v636_v9  }
  0x5f   : > { %444 = vperm.xlu1 %1261, %v440_v13  }
  0x62   : > { %449 = vperm.xlu0 %1260, %v441_v10  }
  0xc9   : > { %v513_v14 = vpop.permute.xlu0 %512 }
  0xca   : > { %v572_v32 = vpop.permute.xlu1 %571 }
  0xcd   : > { %v567_v28 = vpop.permute.xlu0 %566 }
  0xce   : > { %v640_v50 = vpop.permute.xlu1 %639 }
  0xd1   : > { %v645_v51 = vpop.permute.xlu0 %644 }
  0xd2   : > { %v726_v52 = vpop.permute.xlu1 %725 }
  0xd5   : > { %v731_v53 = vpop.permute.xlu0 %730 }
  0xd6   : > { %v815_v54 = vpop.permute.xlu1 %814 }
  0xd9   : > { %v820_v55 = vpop.permute.xlu0 %819 }
  0xda   : > { %v901_v56 = vpop.permute.xlu1 %900 }
  0xdd   : > { %v1620_v57 = vpop.permute.xlu0 %905 }
  0xde   : > { %v445_v58 = vpop.permute.xlu1 %444 }
  0xe1   : > { %v450_v63 = vpop.permute.xlu0 %449 }
 0x11f   : > { %v1581_v15 = vpop.f32.mrb[0].mxu0  ;;  %v552_v16 = vpop.f32.mrb[0].mxu1 }
 0x120   : > { %v553_v17 = vadd.f32 %v552_v16, %v513_v14  ;;  %v1172_v18 = vpop.f32.mrb[1].mxu0  ;;  %v1178_v19 = vpop.f32.mrb[1].mxu1  ;;  %v1627_v61 = vadd.f32 %v1581_v15, %v445_v58 }
 0x121   : > { %v1583_v20 = vpop.f32.mrb[2].mxu0  ;;  %v555_v21 = vpop.f32.mrb[2].mxu1 }
 0x122   : > { %v558_v22 = vmax.f32 %v553_v17, 0.0  ;;  %v1179_v23 = vpop.f32.mrb[3].mxu1  ;;  %v1173_v24 = vpop.f32.mrb[3].mxu0  ;;  %v703_v10 = vsel %vm701_vm4, %v1627_v61, 0.0  ;;  %v791_v18 = vsel %vm789_vm6, %v1627_v61, 0.0 }
 0x124   : > { %v559_v25 = vpack.c.bf16 %v558_v22, %v558_v22 }
 0x126   : > { %v585_v26 = vsel %vm583_vm2, %v559_v25, 0 }
 0x127   : > { %1181 = vmatpush3.bf16.msra.mxu0 %v585_v26 }
 0x128   : > { %1192 = vmatprep.subr.bf16.mxu0 %v1369_v2 }
 0x12a   : > { %1183 = vmatmul.mubr.msk.bf16.vlgmr.msra.gmra.mrb[4].mxu0 %vm579_vm3, %v1264_v27 }
 0x12b   : > { %1194 = vmatprep.mubr.msk.bf16.mxu0 %vm1370_vm0, %v1369_v2 }
 0x1fd   : > { %v621_v29 = vpop.f32.mrb[4].mxu0 }
 0x1fe   : > { %v622_v30 = vadd.f32 %v621_v29, %v567_v28  ;;  %v1184_v31 = vpop.f32.mrb[5].mxu0 }
 0x1ff   : > { %v624_v33 = vpop.f32.mrb[6].mxu0 }
 0x200   : > { %v628_v34 = vmax.f32 %v622_v30, 0.0  ;;  %v625_v35 = vadd.f32 %v624_v33, %v572_v32  ;;  %v1185_v36 = vpop.f32.mrb[7].mxu0 }
 0x202   : > { %v632_v37 = vpack.c.bf16 %v628_v34, %v628_v34  ;;  %v629_v38 = vmax.f32 %v625_v35, 0.0 }
 0x204   : > { %v739_v39 = vrot.slane %v632_v37, 2  ;;  %v807_v40 = vpack.c.bf16 %v629_v38, %v629_v38  ;;  %v656_v41 = vsel %vm583_vm2, %v632_v37, 0  ;;  %v878_v38 = vsel %vm876_vm8, %v1627_v61, 0.0 }
 0x205   : > { %1187 = vmatpush3.bf16.msra.mxu1 %v656_v41 }
 0x206   : > { %v914_v43 = vrot.slane %v807_v40, 2  ;;  %v744_v44 = vsel %vm583_vm2, %v739_v39, 0  ;;  %1198 = vmatprep.subr.bf16.mxu1 %v1369_v2  ;;  %v831_v46 = vsel %vm583_vm2, %v807_v40, 0 }
 0x207   : > { %1193 = vmatpush3.bf16.msra.mxu0 %v744_v44 }
 0x208   : > { %1189 = vmatmul.mubr.msk.bf16.vlgmr.msra.gmra.mrb[4].mxu1 %vm579_vm3, %v1265_v42  ;;  %1204 = vmatprep.subr.bf16.mxu0 %v1369_v2  ;;  %v919_v47 = vsel %vm583_vm2, %v914_v43, 0 }
 0x209   : > { %1199 = vmatpush3.bf16.msra.mxu1 %v831_v46  ;;  %1200 = vmatprep.mubr.msk.bf16.mxu1 %vm1370_vm0, %v1369_v2 }
 0x20a   : > { %1195 = vmatmul.mubr.msk.bf16.vlgmr.msra.gmra.mrb[8].mxu0 %vm579_vm3, %v1266_v45 }
 0x20b   : > { %1205 = vmatpush3.bf16.msra.mxu0 %v919_v47  ;;  %1206 = vmatprep.mubr.msk.bf16.mxu0 %vm1370_vm0, %v1369_v2  ;;  %v505_v2 = vadd.f32 %v1583_v20, %v450_v63 }
 0x20d   : > { %v704_v17 = vsel %vm702_vm5, %v505_v2, 0.0  ;;  %v792_v22 = vsel %vm790_vm7, %v505_v2, 0.0  ;;  %v879_v46 = vsel %vm877_vm9, %v505_v2, 0.0 }
 0x210   : > { %1201 = vmatmul.mubr.msk.bf16.vlgmr.msra.gmra.mrb[8].mxu1 %vm579_vm3, %v1267_v48 }
 0x212   : > { %1207 = vmatmul.mubr.msk.bf16.vlgmr.msra.gmra.mrb[12].mxu0 %vm579_vm3, %v1268_v49  ;;  %v966_v49 = vsel %vm964_vm10, %v1627_v61, 0.0 }
 0x2db   : > { %v692_v62 = vpop.f32.mrb[4].mxu1 }
 0x2dc   : > { %v693_v0 = vadd.f32 %v692_v62, %v640_v50  ;;  %v1190_v1 = vpop.f32.mrb[5].mxu1 }
 0x2dd   : > { %v695_v3 = vpop.f32.mrb[6].mxu1  ;;  %v780_v4 = vpop.f32.mrb[8].mxu0 }
 0x2de   : > { %v699_v5 = vmax.f32 %v693_v0, 0.0  ;;  %v696_v6 = vadd.f32 %v695_v3, %v645_v51  ;;  %v781_v7 = vadd.f32 %v780_v4, %v726_v52  ;;  %v1196_v8 = vpop.f32.mrb[9].mxu0  ;;  %v1191_v9 = vpop.f32.mrb[7].mxu1  ;;  %v967_v52 = vsel %vm965_vm11, %v505_v2, 0.0 }
 0x2df   : > { %v783_v11 = vpop.f32.mrb[10].mxu0 }
 0x2e0   : > { %v705_v12 = vadd.f32 %v703_v10, %v699_v5  ;;  %v700_v13 = vmax.f32 %v696_v6, 0.0  ;;  %v787_v14 = vmax.f32 %v781_v7, 0.0  ;;  %v784_v15 = vadd.f32 %v783_v11, %v731_v53  ;;  %v1197_v16 = vpop.f32.mrb[11].mxu0 }
 0x2e2   : > { %v706_v19 = vadd.f32 %v704_v17, %v700_v13  ;;  %v793_v20 = vadd.f32 %v791_v18, %v787_v14  ;;  %v788_v21 = vmax.f32 %v784_v15, 0.0  ;;  %v707_v24 = vmax.f32 %v705_v12, 0.0 }
 0x2e3   : > { %v867_v23 = vpop.f32.mrb[8].mxu1 }
 0x2e4   : > { %v708_v25 = vmax.f32 %v706_v19, 0.0  ;;  %v794_v26 = vadd.f32 %v792_v22, %v788_v21  ;;  %v868_v27 = vadd.f32 %v867_v23, %v815_v54  ;;  %v1202_v28 = vpop.f32.mrb[9].mxu1  ;;  %v795_v29 = vmax.f32 %v793_v20, 0.0 }
 0x2e5   : > { %v870_v30 = vpop.f32.mrb[10].mxu1  ;;  %v955_v31 = vpop.f32.mrb[12].mxu0 }
 0x2e6   : > { %v1134_v32 = vpack.c.bf16 %v708_v25, %v707_v24  ;;  %v796_v33 = vmax.f32 %v794_v26, 0.0  ;;  %v874_v34 = vmax.f32 %v868_v27, 0.0  ;;  %v871_v35 = vadd.f32 %v870_v30, %v820_v55  ;;  %v1208_v36 = vpop.f32.mrb[13].mxu0  ;;  %v1203_v37 = vpop.f32.mrb[11].mxu1 }
 0x2e7   : > { %v956_v39 = vadd.f32 %v955_v31, %v901_v56  ;;  %v958_v40 = vpop.f32.mrb[14].mxu0 }
 0x2e8   : > { %1135 = vst [vmem:[%s434_s22] sm:$0xff] %v1134_v32   ;;  %v1139_v41 = vpack.c.bf16 %v796_v33, %v795_v29  ;;  %v880_v42 = vadd.f32 %v878_v38, %v874_v34  ;;  %v875_v43 = vmax.f32 %v871_v35, 0.0  ;;  %v959_v44 = vadd.f32 %v958_v40, %v1620_v57  ;;  %v1209_v45 = vpop.f32.mrb[15].mxu0 }
 0x2e9   : > { %v962_v47 = vmax.f32 %v956_v39, 0.0 }
 0x2ea   : > { %1151 = vst [vmem:[%s434_s22 + $0x8] sm:$0xff] %v1139_v41   ;;  %v881_v48 = vadd.f32 %v879_v46, %v875_v43  ;;  %v963_v50 = vmax.f32 %v959_v44, 0.0  ;;  %v882_v53 = vmax.f32 %v880_v42, 0.0 }
 0x2eb   : > { %v968_v51 = vadd.f32 %v966_v49, %v962_v47 }
 0x2ec   : > { %v883_v54 = vmax.f32 %v881_v48, 0.0  ;;  %v969_v55 = vadd.f32 %v967_v52, %v963_v50 }
 0x2ed   : > { %v970_v57 = vmax.f32 %v968_v51, 0.0 }
 0x2ee   : > { %v1144_v56 = vpack.c.bf16 %v883_v54, %v882_v53  ;;  %v971_v58 = vmax.f32 %v969_v55, 0.0 }
 0x2f0   : > { %1152 = vst [vmem:[%s434_s22 + $0x10] sm:$0xff] %v1144_v56   ;;  %v1149_v59 = vpack.c.bf16 %v971_v58, %v970_v57 }
 0x2f2   : > { %1153 = vst [vmem:[%s434_s22 + $0x18] sm:$0xff] %v1149_v59  }
 0x2f3   : > { %1310 = shalt.err (!%p1307_p12)
}
 0x2f4   : > { %s1311_s20 = scalar_lea.hbm %s1658_s15, 512  ;;  %s1315_s24 = scalar_lea.hbm %s1711_s10, 2048 }
 0x2f5   : > { %p1312_p13 = scmp.ne.s32.totalorder %s1658_s15, %s1311_s20  ;;  %p1316_p9 = scmp.lt.u32.totalorder %s1658_s15, %s1711_s10 }
 0x2f6   : > { %p1317_p10 = scmp.lt.u32.totalorder %s1315_s24, %s1311_s20  ;;  %p1319_p6 = scmp.lt.u32.totalorder %s1311_s20, %s1658_s15 }
 0x2f7   : > { %p1313_p1 = pnand %p1312_p13, %p1725_p0 }
 0x2f8   : > { %p1318_p5 = por %p1317_p10, %p1316_p9 }
 0x2f9   : > { %p1314_p2 = pneg %p1313_p1 }
 0x2fa   : > { %p1320_p3 = por %p1319_p6, %p1318_p5 }
 0x2fc   : > { %p1321_p4 = pnand %p1320_p3, %p1314_p2 }
 0x2fe   : > { %1324 = shalt.err (!%p1321_p4)
}
 0x2ff   : > { %s1373_s11 = smov 64   ;;  %s1374_s29 = smov 256  }
 0x300   : > { %s1375_s18 = smov 4  }
 0x301   : > { %1212 = dma.vmem_to_hbm [thread:$0]  (%p1725_p0), %s1653_s30, 512, %s1658_s15, %s983_s19, %s1373_s11, %s1374_s29, %s1375_s18  }
 0x302 PF: > { %p1218_p7 = scmp.ge.s32.totalorder %s1363_s16, 2  ;;  %s1010_s17 = sand.u32 1, %s1351_s13  }
 0x303   : > { %p1726_p8 = scmp.ne.s32.totalorder %s1723_s26, 0  ;;  %s1011_s27 = scalar_lea.sflag [#allocation4], %s1010_s17 }
 0x305   : > { %p1215_p11 = pnand %p1218_p7, %p1726_p8 }
 0x307   : > { %1346 = dma.done.wait (!%p1215_p11), %s1011_s27, 512  }
 0x308   : > { %1348 = vsyncadd (!%p1215_p11), %s1011_s27, 4294966784  ;;  %s1727_s16 = sld [smem:[#allocation10_spill]]  ;;  %s1728_s12 = sld [smem:[#allocation9_spill]] }
 0x309   : > { %s1729_s15 = sld [smem:[#allocation11_spill]]  ;;  %s1730_s13 = smov %s1355_s14 }
 0x30e   : > { %p23_p12 = scmp.ge.s32.totalorder %s1727_s16, 6   ;;  %s1731_s14 = smov %s1728_s12 }
 0x310   :  { %25 = sbr.rel (!%p23_p12) target bundleno = 7 (0x7), region = 151 }
 0x317   :  { %1016 = vsyncpa [#allocation3], 1 }
 0x318   :  { %1018 = vsyncpa [#allocation3 + $0x1], 1 }
 0x319   :  { %1019 = vsyncpa [#allocation4], 1 }
 0x31a   :  { %1021 = vsyncpa [#allocation4 + $0x1], 1 }

</bundles_post_ra>
